<compile_context>
chip_gen: v7x
topology: tpu7x:2x2x1
jax: 0.10.0
libtpu: 0.0.40
codegen_flags: <defaults>
</compile_context>

<pallas_src>
import jax
import jax.numpy as jnp
from jax.experimental import pallas as pl
from jax.experimental.pallas import tpu as pltpu


def _mlp_kernel(x_ref, w1_ref, b1_ref, w2_ref, b2_ref, o_ref):
    # Cast x to bf16 in VMEM (cheap VPU cast, hidden under the tile DMA); the HBM
    # stream for x stays a single f32 read with no wrapper-side convert round trip.
    x = x_ref[...].astype(jnp.bfloat16)
    # Layer 1: Linear (bf16 operands, f32 accumulation on the MXU) + Sigmoid.
    h = jnp.dot(x, w1_ref[...], preferred_element_type=jnp.float32)
    h = h + b1_ref[...]                       # b1 is (1, hidden) -> broadcast over batch
    h = jax.nn.sigmoid(h)                     # exp on EUP; numerically safe sigmoid
    # Dropout(0.1) in eval/inference mode == identity.
    # TODO(synk): training-mode dropout (scaled Bernoulli mask via pltpu.prng_*) not emitted.
    # Layer 2: Linear (activations back to bf16 so the MXU runs at bf16 rate).
    out = jnp.dot(h.astype(w2_ref.dtype), w2_ref[...],
                  preferred_element_type=jnp.float32)
    o_ref[...] = (out + b2_ref[...]).astype(o_ref.dtype)   # b2 is (1, output)


def prepare_params(w1, b1, w2, b2):
    """One-time (model-load) dtype prep: bf16 weights for the MXU, f32 biases.

    Keeps per-call wrapper free of standalone XLA converts (they dominated wall
    time for small-batch calls)."""
    return (w1.astype(jnp.bfloat16),
            b1.astype(jnp.float32).reshape(1, -1),
            w2.astype(jnp.bfloat16),
            b2.astype(jnp.float32).reshape(1, -1))


_MIN_SPLIT_B = 256   # below this, a single grid point is cheaper than 2 steps


def _round_up(n, m):
    return ((n + m - 1) // m) * m


def _choose_batch_tile(B, batch_tile):
    """Pick a batch tile: full-array block for tiny B, an even 2-way split for
    mid-size B (so v7x's 2 TensorCores each get a block), capped tile otherwise.
    Tiles are multiples of 16 (bf16 sublane packing) unless they equal B."""
    if B <= _MIN_SPLIT_B:
        return B                              # single grid point; block == full dim
    if B <= 2 * batch_tile:
        return min(_round_up(pl.cdiv(B, 2), 16), B)   # exactly 2 parallel blocks
    return batch_tile


def simple_classifier_forward(x, w1, b1, w2, b2, *, batch_tile=512):
    """x: [B, input_dim] (any float dtype; kept f32 on the wire, cast in-kernel),
       w1: [input_dim, hidden] bf16, b1: [1, hidden] f32,
       w2: [hidden, output]   bf16, b2: [1, output] f32
       -> logits [B, output] (float32)."""
    B, in_dim = x.shape
    hidden = w1.shape[1]
    out_dim = w2.shape[1]

    tile = _choose_batch_tile(B, batch_tile)
    grid = (pl.cdiv(B, tile),)                # ragged last block handled by Pallas

    # Weights / biases map to block (0, 0) at every grid step, so they are DMA'd
    # once and stay VMEM-resident; x / out blocks auto double-buffer, overlapping
    # DMA with MXU work.
    return pl.pallas_call(
        _mlp_kernel,
        out_shape=jax.ShapeDtypeStruct((B, out_dim), jnp.float32),
        grid=grid,
        in_specs=[
            pl.BlockSpec((tile, in_dim), lambda i: (i, 0)),
            pl.BlockSpec((in_dim, hidden), lambda i: (0, 0)),
            pl.BlockSpec((1, hidden), lambda i: (0, 0)),
            pl.BlockSpec((hidden, out_dim), lambda i: (0, 0)),
            pl.BlockSpec((1, out_dim), lambda i: (0, 0)),
        ],
        out_specs=pl.BlockSpec((tile, out_dim), lambda i: (i, 0)),
        compiler_params=pltpu.CompilerParams(
            # Independent batch blocks -> shard across both TensorCores on v7x.
            dimension_semantics=("parallel",),
        ),
    )(x, w1, b1, w2, b2)


def _reference(x, w1_bf16, b1, w2_bf16, b2):
    # Pure-JAX reference with the same bf16-operand / f32-accumulate semantics.
    h = jnp.dot(x.astype(jnp.bfloat16), w1_bf16,
                preferred_element_type=jnp.float32) + b1
    h = jax.nn.sigmoid(h)
    out = jnp.dot(h.astype(jnp.bfloat16), w2_bf16,
                  preferred_element_type=jnp.float32) + b2
    return out


def _init_linear(key, fan_in, fan_out):
    # Mirrors torch.nn.Linear default init: U(-1/sqrt(fan_in), 1/sqrt(fan_in)).
    kw, kb = jax.random.split(key)
    bound = 1.0 / jnp.sqrt(float(fan_in))
    # Stored as [in, out] (transposed vs. torch's [out, in]) for direct x @ W.
    w = jax.random.uniform(kw, (fan_in, fan_out), jnp.float32, -bound, bound)
    b = jax.random.uniform(kb, (1, fan_out), jnp.float32, -bound, bound)
    return w, b


if __name__ == "__main__":
    INPUT_DIM, HIDDEN_DIM, OUTPUT_DIM = 784, 300, 10

    root = jax.random.PRNGKey(0)
    k_x, k_l1, k_l2, k_xl = jax.random.split(root, 4)

    w1_f32, b1_f32 = _init_linear(k_l1, INPUT_DIM, HIDDEN_DIM)
    w2_f32, b2_f32 = _init_linear(k_l2, HIDDEN_DIM, OUTPUT_DIM)

    # One-time param prep at "model load" (not inside the per-call wrapper).
    w1, b1, w2, b2 = prepare_params(w1_f32, b1_f32, w2_f32, b2_f32)

    fwd = jax.jit(simple_classifier_forward)

    # Small batch -> single grid point (block == full array dims).
    x_small = jax.random.normal(k_x, (8, INPUT_DIM), jnp.float32)
    logits = fwd(x_small, w1, b1, w2, b2)
    jax.block_until_ready(logits)
    ref = _reference(x_small, w1, b1, w2, b2)
    assert logits.shape == (8, OUTPUT_DIM)
    assert jnp.allclose(logits, ref, atol=2e-2, rtol=2e-2), float(
        jnp.max(jnp.abs(logits - ref)))

    # Ragged larger batch -> cdiv-tiled path (2 even parallel blocks, weights
    # VMEM-resident, masked ragged last block).
    x_big = jax.random.normal(k_xl, (600, INPUT_DIM), jnp.float32)
    logits_big = fwd(x_big, w1, b1, w2, b2)
    jax.block_until_ready(logits_big)
    ref_big = _reference(x_big, w1, b1, w2, b2)
    assert logits_big.shape == (600, OUTPUT_DIM)
    assert jnp.allclose(logits_big, ref_big, atol=2e-2, rtol=2e-2), float(
        jnp.max(jnp.abs(logits_big - ref_big)))

    print("KERNEL_OK")
</pallas_src>

<mosaic_0001>
module attributes {stable_mosaic.version = 11 : i64} {
  func.func @_mlp_kernel(%arg0: i32, %arg1: memref<8x784xf32, #tpu.memory_space<vmem>>, %arg2: memref<784x300xbf16, #tpu.memory_space<vmem>>, %arg3: memref<1x300xf32, #tpu.memory_space<vmem>>, %arg4: memref<300x10xbf16, #tpu.memory_space<vmem>>, %arg5: memref<1x10xf32, #tpu.memory_space<vmem>>, %arg6: memref<8x10xf32, #tpu.memory_space<vmem>>) attributes {dimension_semantics = [#tpu.dimension_semantics<parallel>], iteration_bounds = array<i64: 1>, scalar_prefetch = 0 : i64, scratch_operands = 0 : i64, tpu.core_type = #tpu.core_type<tc>, window_params = [{transform_indices = @transform_0, window_bounds = array<i64: 8, 784>}, {pipeline_mode = #tpu.pipeline_mode<synchronous>, transform_indices = @transform_1, window_bounds = array<i64: 784, 300>}, {pipeline_mode = #tpu.pipeline_mode<synchronous>, transform_indices = @transform_2, window_bounds = array<i64: 1, 300>}, {pipeline_mode = #tpu.pipeline_mode<synchronous>, transform_indices = @transform_3, window_bounds = array<i64: 300, 10>}, {pipeline_mode = #tpu.pipeline_mode<synchronous>, transform_indices = @transform_4, window_bounds = array<i64: 1, 10>}, {transform_indices = @transform_5, window_bounds = array<i64: 8, 10>}]} {
    %c0 = arith.constant 0 : index
    %c0_0 = arith.constant 0 : index
    %0 = vector.load %arg1[%c0, %c0_0] : memref<8x784xf32, #tpu.memory_space<vmem>>, vector<8x784xf32>
    %1 = arith.truncf %0 : vector<8x784xf32> to vector<8x784xbf16>
    %c0_1 = arith.constant 0 : index
    %c0_2 = arith.constant 0 : index
    %2 = vector.load %arg2[%c0_1, %c0_2] : memref<784x300xbf16, #tpu.memory_space<vmem>>, vector<784x300xbf16>
    %cst = arith.constant dense<0.000000e+00> : vector<8x300xf32>
    %3 = tpu.matmul %1, %2, %cst {dimension_numbers = #tpu.dot_dimension_numbers<[1], [0], [0], [1], [0, 0, 1, 1], [], []>} : vector<8x784xbf16>, vector<784x300xbf16>, vector<8x300xf32> -> vector<8x300xf32>
    %c0_3 = arith.constant 0 : index
    %c0_4 = arith.constant 0 : index
    %4 = vector.load %arg3[%c0_3, %c0_4] : memref<1x300xf32, #tpu.memory_space<vmem>>, vector<1x300xf32>
    %5 = vector.broadcast %4 : vector<1x300xf32> to vector<8x300xf32>
    %6 = arith.addf %3, %5 : vector<8x300xf32>
    %7 = arith.negf %6 : vector<8x300xf32>
    %8 = math.exp %7 : vector<8x300xf32>
    %cst_5 = arith.constant 1.000000e+00 : f32
    %9 = vector.broadcast %cst_5 : f32 to vector<8x300xf32>
    %10 = arith.addf %9, %8 : vector<8x300xf32>
    %11 = arith.divf %9, %10 : vector<8x300xf32>
    %12 = arith.truncf %11 : vector<8x300xf32> to vector<8x300xbf16>
    %c0_6 = arith.constant 0 : index
    %c0_7 = arith.constant 0 : index
    %13 = vector.load %arg4[%c0_6, %c0_7] : memref<300x10xbf16, #tpu.memory_space<vmem>>, vector<300x10xbf16>
    %cst_8 = arith.constant dense<0.000000e+00> : vector<8x10xf32>
    %14 = tpu.matmul %12, %13, %cst_8 {dimension_numbers = #tpu.dot_dimension_numbers<[1], [0], [0], [1], [0, 0, 1, 1], [], []>} : vector<8x300xbf16>, vector<300x10xbf16>, vector<8x10xf32> -> vector<8x10xf32>
    %c0_9 = arith.constant 0 : index
    %c0_10 = arith.constant 0 : index
    %15 = vector.load %arg5[%c0_9, %c0_10] : memref<1x10xf32, #tpu.memory_space<vmem>>, vector<1x10xf32>
    %16 = vector.broadcast %15 : vector<1x10xf32> to vector<8x10xf32>
    %17 = arith.addf %14, %16 : vector<8x10xf32>
    %c0_11 = arith.constant 0 : index
    %c0_12 = arith.constant 0 : index
    %18 = vector.load %arg6[%c0_11, %c0_12] : memref<8x10xf32, #tpu.memory_space<vmem>>, vector<8x10xf32>
    tpu.vector_store %arg6[%c0_11, %c0_12], %17 {strides = array<i32>} : memref<8x10xf32, #tpu.memory_space<vmem>>, vector<8x10xf32>,
    return
  }
  func.func @transform_0(%arg0: i32) -> (i32, i32) {
    %c0_i32 = arith.constant 0 : i32
    %c0_i32_0 = arith.constant 0 : i32
    return %arg0, %c0_i32 : i32, i32
  }
  func.func @transform_1(%arg0: i32) -> (i32, i32) {
    %c0_i32 = arith.constant 0 : i32
    %c0_i32_0 = arith.constant 0 : i32
    %c0_i32_1 = arith.constant 0 : i32
    return %c0_i32, %c0_i32_0 : i32, i32
  }
  func.func @transform_2(%arg0: i32) -> (i32, i32) {
    %c0_i32 = arith.constant 0 : i32
    %c0_i32_0 = arith.constant 0 : i32
    %c0_i32_1 = arith.constant 0 : i32
    return %c0_i32, %c0_i32_0 : i32, i32
  }
  func.func @transform_3(%arg0: i32) -> (i32, i32) {
    %c0_i32 = arith.constant 0 : i32
    %c0_i32_0 = arith.constant 0 : i32
    %c0_i32_1 = arith.constant 0 : i32
    return %c0_i32, %c0_i32_0 : i32, i32
  }
  func.func @transform_4(%arg0: i32) -> (i32, i32) {
    %c0_i32 = arith.constant 0 : i32
    %c0_i32_0 = arith.constant 0 : i32
    %c0_i32_1 = arith.constant 0 : i32
    return %c0_i32, %c0_i32_0 : i32, i32
  }
  func.func @transform_5(%arg0: i32) -> (i32, i32) {
    %c0_i32 = arith.constant 0 : i32
    %c0_i32_0 = arith.constant 0 : i32
    return %arg0, %c0_i32 : i32, i32
  }
}

</mosaic_0001>

<bundles_post_ra>
// kernel: simple_classifier_forward.1
= control target key start
LH: loop header
LB: loop body
LE: loop exit
PB: predicated region body
PF: predicated region fallthrough
CT: control target
= control target key end

     0   :  { %v2194_v2 = vmov 0   ;;  %vm1033_vm0 = vcmask 130048   ;;  %vm2196_vm1 = vmmov 0   ;;  %s2793_s0 = inlined_call_operand.vmem [shape: f32[8,784], index: 0, kind: input, shape index: {}]   ;;  %s2794_s1 = inlined_call_operand.vmem [shape: bf16[784,300], index: 1, kind: input, shape index: {}]   ;;  %s2795_s2 = inlined_call_operand.vmem [shape: f32[1,300], index: 2, kind: input, shape index: {}]   ;;  %s2796_s3 = inlined_call_operand.vmem [shape: bf16[300,10], index: 3, kind: input, shape index: {}]   ;;  %s2797_s4 = inlined_call_operand.vmem [shape: f32[1,10], index: 4, kind: input, shape index: {}]   ;;  %s2798_s5 = inlined_call_operand.hbm [shape: f32[8,10], index: 5, kind: output, shape index: {}]  }
   0x1   :  { %v1943_v0 = vld [vmem:[%s2794_s1 + $0x4] ss:$12 sps:$4 sm:$0xff]   ;;  %v1945_v1 = vld [vmem:[%s2794_s1] ss:$12 sps:$4 sm:$0xff]   ;;  %1192 = vmatprep.mubr.bf16.mxu1 %v2194_v2  ;;  %v1946_v3 = vld [vmem:[%s2794_s1 + $0x1c] ss:$12 sps:$4 sm:$0xff]  }
   0x2   :  { %1037 = vmatprep.subr.bf16.mxu0 %v1943_v0  ;;  %v1948_v4 = vld [vmem:[%s2794_s1 + $0x18] ss:$12 sps:$4 sm:$0xff]   ;;  %v1949_v5 = vld [vmem:[%s2794_s1 + $0x34] ss:$12 sps:$4 sm:$0xff]   ;;  %v1951_v6 = vld [vmem:[%s2794_s1 + $0x30] ss:$12 sps:$4 sm:$0xff]  }
   0x3   :  { %1038 = vmatpush1.bf16.msra.mxu0 %v1945_v1  ;;  %v1952_v7 = vld [vmem:[%s2794_s1 + $0x4c] ss:$12 sps:$4 sm:$0xff]   ;;  %v1954_v8 = vld [vmem:[%s2794_s1 + $0x48] ss:$12 sps:$4 sm:$0xff]   ;;  %v1955_v9 = vld [vmem:[%s2794_s1 + $0x64] ss:$12 sps:$4 sm:$0xff]  }
   0x4   :  { %1039 = vmatprep.subr.bf16.mxu0 %v1946_v3  ;;  %v1970_v10 = vld [vmem:[%s2794_s1 + $0x484] ss:$12 sps:$4 sm:$0xff]   ;;  %v1957_v11 = vld [vmem:[%s2794_s1 + $0x60] ss:$12 sps:$4 sm:$0xff]   ;;  %v1976_v13 = vld [vmem:[%s2794_s1 + $0xc8] ss:$12 sps:$4 sm:$0xff]  }
   0x5   :  { %1160 = vmatprep.subr.bf16.mxu1 %v1970_v10  ;;  %v1974_v12 = vld [vmem:[%s2794_s1 + $0x480] ss:$12 sps:$4 sm:$0xff]   ;;  %v1958_v14 = vld [vmem:[%s2794_s1 + $0x7c] ss:$12 sps:$4 sm:$0xff]   ;;  %v28_v15 = vld [vmem:[%s2793_s0 + $0x30] sm:$0xff] }
   0x6   :  { %1161 = vmatpush1.bf16.msra.mxu1 %v1974_v12  ;;  %v2273_v16 = vpack.c.bf16 %v28_v15, %v28_v15  ;;  %v1979_v17 = vld [vmem:[%s2794_s1 + $0x8] ss:$12 sps:$4 sm:$0xff]   ;;  %v1960_v18 = vld [vmem:[%s2794_s1 + $0x78] ss:$12 sps:$4 sm:$0xff]   ;;  %v1981_v19 = vld [vmem:[%s2794_s1 + $0xe0] ss:$12 sps:$4 sm:$0xff]  }
   0x7   :  { %1040 = vmatpush1.bf16.msra.mxu0 %v1948_v4  ;;  %1817 = vmatprep.subr.bf16.mxu1 %v1976_v13  ;;  %v1961_v20 = vld [vmem:[%s2794_s1 + $0x94] ss:$12 sps:$4 sm:$0xff]   ;;  %v1986_v22 = vld [vmem:[%s2794_s1 + $0xf8] ss:$12 sps:$4 sm:$0xff]   ;;  %v1963_v23 = vld [vmem:[%s2794_s1 + $0x90] ss:$12 sps:$4 sm:$0xff]  }
   0x8   :  { %1041 = vmatprep.subr.bf16.mxu0 %v1949_v5  ;;  %v1984_v21 = vld [vmem:[%s2794_s1 + $0x20] ss:$12 sps:$4 sm:$0xff]   ;;  %v1989_v25 = vld [vmem:[%s2794_s1 + $0x38] ss:$12 sps:$4 sm:$0xff]   ;;  %v1991_v26 = vld [vmem:[%s2794_s1 + $0x110] ss:$12 sps:$4 sm:$0xff]  }
   0x9   :  { %1791 = vmatmul.mubr.msk.bf16.vlgmr.msra.gmra.mrb[0].mxu1 %vm1033_vm0, %v2273_v16  ;;  %v1964_v24 = vld [vmem:[%s2794_s1 + $0xac] ss:$12 sps:$4 sm:$0xff]   ;;  %v1966_v27 = vld [vmem:[%s2794_s1 + $0xa8] ss:$12 sps:$4 sm:$0xff]   ;;  %v1967_v28 = vld [vmem:[%s2794_s1 + $0xc4] ss:$12 sps:$4 sm:$0xff]  }
   0xa   :  { %1818 = vmatpush3.bf16.msra.mxu1 %v1979_v17  ;;  %v1994_v29 = vld [vmem:[%s2794_s1 + $0x50] ss:$12 sps:$4 sm:$0xff]   ;;  %v1996_v30 = vld [vmem:[%s2794_s1 + $0x128] ss:$12 sps:$4 sm:$0xff]   ;;  %v1969_v31 = vld [vmem:[%s2794_s1 + $0xc0] ss:$12 sps:$4 sm:$0xff]  }
   0xb   :  { %1042 = vmatpush1.bf16.msra.mxu0 %v1951_v6  ;;  %1819 = vmatprep.subr.bf16.mxu1 %v1981_v19  ;;  %v1972_v32 = vld [vmem:[%s2794_s1 + $0xdc] ss:$12 sps:$4 sm:$0xff]   ;;  %v2001_v34 = vld [vmem:[%s2794_s1 + $0x140] ss:$12 sps:$4 sm:$0xff]   ;;  %v1975_v35 = vld [vmem:[%s2794_s1 + $0xd8] ss:$12 sps:$4 sm:$0xff]  }
   0xc   :  { %1043 = vmatprep.subr.bf16.mxu0 %v1952_v7  ;;  %v1999_v33 = vld [vmem:[%s2794_s1 + $0x68] ss:$12 sps:$4 sm:$0xff]   ;;  %v2004_v37 = vld [vmem:[%s2794_s1 + $0x80] ss:$12 sps:$4 sm:$0xff]   ;;  %v2006_v39 = vld [vmem:[%s2794_s1 + $0x158] ss:$12 sps:$4 sm:$0xff]  }
   0xd   :  { %v1977_v36 = vld [vmem:[%s2794_s1 + $0xf4] ss:$12 sps:$4 sm:$0xff]   ;;  %v23_v38 = vld [vmem:[%s2793_s0 + $0x8] sm:$0xff]  ;;  %v1980_v41 = vld [vmem:[%s2794_s1 + $0xf0] ss:$12 sps:$4 sm:$0xff]  }
   0xe   :  { %1820 = vmatpush3.bf16.msra.mxu1 %v1984_v21  ;;  %v30_v40 = vpack.c.bf16 %v23_v38, %v23_v38  ;;  %v1982_v42 = vld [vmem:[%s2794_s1 + $0x10c] ss:$12 sps:$4 sm:$0xff]   ;;  %v2011_v44 = vld [vmem:[%s2794_s1 + $0x170] ss:$12 sps:$4 sm:$0xff]   ;;  %v1985_v45 = vld [vmem:[%s2794_s1 + $0x108] ss:$12 sps:$4 sm:$0xff]  }
   0xf   :  { %1044 = vmatpush1.bf16.msra.mxu0 %v1954_v8  ;;  %1821 = vmatprep.subr.bf16.mxu1 %v1986_v22  ;;  %v2010_v43 = vld [vmem:[%s2794_s1 + $0x98] ss:$12 sps:$4 sm:$0xff]   ;;  %v2015_v47 = vld [vmem:[%s2794_s1 + $0xb0] ss:$12 sps:$4 sm:$0xff]   ;;  %v2016_v48 = vld [vmem:[%s2794_s1 + $0x248] ss:$12 sps:$4 sm:$0xff]  }
  0x10   :  { %1045 = vmatprep.subr.bf16.mxu0 %v1955_v9  ;;  %1069 = vmatprep.mubr.bf16.mxu0 %v30_v40  ;;  %v1987_v46 = vld [vmem:[%s2794_s1 + $0x124] ss:$12 sps:$4 sm:$0xff]   ;;  %v1990_v50 = vld [vmem:[%s2794_s1 + $0x120] ss:$12 sps:$4 sm:$0xff]   ;;  %v1992_v51 = vld [vmem:[%s2794_s1 + $0x13c] ss:$12 sps:$4 sm:$0xff]  }
  0x11   :  { %1233 = vmatprep.mubr.bf16.mxu1 %v30_v40  ;;  %v22_v49 = vld [vmem:[%s2793_s0] sm:$0xff]  ;;  %v2020_v52 = vld [vmem:[%s2794_s1 + $0x188] ss:$12 sps:$4 sm:$0xff]   ;;  %v2000_v59 = vld [vmem:[%s2794_s1 + $0x150] ss:$12 sps:$4 sm:$0xff]  }
  0x12   :  { %1822 = vmatpush3.bf16.msra.mxu1 %v1989_v25  ;;  %v29_v53 = vpack.c.bf16 %v22_v49, %v22_v49  ;;  %v2021_v54 = vld [vmem:[%s2794_s1 + $0x260] ss:$12 sps:$4 sm:$0xff]   ;;  %v1995_v55 = vld [vmem:[%s2794_s1 + $0x138] ss:$12 sps:$4 sm:$0xff]   ;;  %v2031_v62 = vld [vmem:[%s2794_s1 + $0x290] ss:$12 sps:$4 sm:$0xff]  }
  0x13   :  { %1046 = vmatpush1.bf16.msra.mxu0 %v1957_v11  ;;  %1823 = vmatprep.subr.bf16.mxu1 %v1991_v26  ;;  %v1997_v56 = vld [vmem:[%s2794_s1 + $0x154] ss:$12 sps:$4 sm:$0xff]   ;;  %v2026_v58 = vld [vmem:[%s2794_s1 + $0x278] ss:$12 sps:$4 sm:$0xff]   ;;  %v2035_v1 = vld [vmem:[%s2794_s1 + $0x1d0] ss:$12 sps:$4 sm:$0xff]  }
  0x14   :  { %1047 = vmatprep.subr.bf16.mxu0 %v1958_v14  ;;  %v2025_v57 = vld [vmem:[%s2794_s1 + $0x1a0] ss:$12 sps:$4 sm:$0xff]   ;;  %v2030_v61 = vld [vmem:[%s2794_s1 + $0x1b8] ss:$12 sps:$4 sm:$0xff]   ;;  %v2005_v63 = vld [vmem:[%s2794_s1 + $0x168] ss:$12 sps:$4 sm:$0xff]  }
  0x15   :  { %v2002_v60 = vld [vmem:[%s2794_s1 + $0x16c] ss:$12 sps:$4 sm:$0xff]   ;;  %v2009_v0 = vld [vmem:[%s2794_s1 + $0x184] ss:$12 sps:$4 sm:$0xff]   ;;  %v2036_v2 = vld [vmem:[%s2794_s1 + $0x2a8] ss:$12 sps:$4 sm:$0xff]  }
  0x16   :  { %1824 = vmatpush3.bf16.msra.mxu1 %v1994_v29  ;;  %v2007_v3 = vld [vmem:[%s2794_s1 + $0x180] ss:$12 sps:$4 sm:$0xff]   ;;  %v2014_v4 = vld [vmem:[%s2794_s1 + $0x19c] ss:$12 sps:$4 sm:$0xff]   ;;  %v2012_v7 = vld [vmem:[%s2794_s1 + $0x198] ss:$12 sps:$4 sm:$0xff]  }
  0x17   :  { %1048 = vmatpush1.bf16.msra.mxu0 %v1960_v18  ;;  %1825 = vmatprep.subr.bf16.mxu1 %v1996_v30  ;;  %v2040_v5 = vld [vmem:[%s2794_s1 + $0x1e8] ss:$12 sps:$4 sm:$0xff]   ;;  %v2041_v6 = vld [vmem:[%s2794_s1 + $0x2c0] ss:$12 sps:$4 sm:$0xff]   ;;  %v2046_v10 = vld [vmem:[%s2794_s1 + $0x2d8] ss:$12 sps:$4 sm:$0xff]  }
  0x18   :  { %1049 = vmatprep.subr.bf16.mxu0 %v1961_v20  ;;  %v2019_v8 = vld [vmem:[%s2794_s1 + $0x1b4] ss:$12 sps:$4 sm:$0xff]   ;;  %v25_v11 = vld [vmem:[%s2793_s0 + $0x18] sm:$0xff]  ;;  %v2029_v19 = vld [vmem:[%s2794_s1 + $0x1e4] ss:$12 sps:$4 sm:$0xff]  }
  0x19   :  { %v2045_v9 = vld [vmem:[%s2794_s1 + $0x200] ss:$12 sps:$4 sm:$0xff]   ;;  %v32_v12 = vpack.c.bf16 %v25_v11, %v25_v11  ;;  %v2017_v13 = vld [vmem:[%s2794_s1 + $0x1b0] ss:$12 sps:$4 sm:$0xff]   ;;  %v2050_v15 = vld [vmem:[%s2794_s1 + $0x218] ss:$12 sps:$4 sm:$0xff]  }
  0x1a   :  { %1826 = vmatpush3.bf16.msra.mxu1 %v1999_v33  ;;  %v2024_v14 = vld [vmem:[%s2794_s1 + $0x1cc] ss:$12 sps:$4 sm:$0xff]   ;;  %v2022_v17 = vld [vmem:[%s2794_s1 + $0x1c8] ss:$12 sps:$4 sm:$0xff]   ;;  %v2051_v18 = vld [vmem:[%s2794_s1 + $0x2f0] ss:$12 sps:$4 sm:$0xff]  }
  0x1b   :  { %1050 = vmatpush1.bf16.msra.mxu0 %v1963_v23  ;;  %1827 = vmatprep.subr.bf16.mxu1 %v2001_v34  ;;  %v2055_v20 = vld [vmem:[%s2794_s1 + $0x230] ss:$12 sps:$4 sm:$0xff]   ;;  %v2056_v22 = vld [vmem:[%s2794_s1 + $0x3c8] ss:$12 sps:$4 sm:$0xff]   ;;  %v2027_v23 = vld [vmem:[%s2794_s1 + $0x1e0] ss:$12 sps:$4 sm:$0xff]  }
  0x1c   :  { %1051 = vmatprep.subr.bf16.mxu0 %v1964_v24  ;;  %v24_v21 = vld [vmem:[%s2793_s0 + $0x10] sm:$0xff]  ;;  %v2034_v24 = vld [vmem:[%s2794_s1 + $0x1fc] ss:$12 sps:$4 sm:$0xff]   ;;  %v2065_v30 = vld [vmem:[%s2794_s1 + $0x320] ss:$12 sps:$4 sm:$0xff]  }
  0x1d   :  { %v2481_v25 = vpack.c.bf16 %v24_v21, %v24_v21  ;;  %v2060_v26 = vld [vmem:[%s2794_s1 + $0x308] ss:$12 sps:$4 sm:$0xff]   ;;  %v2044_v33 = vld [vmem:[%s2794_s1 + $0x22c] ss:$12 sps:$4 sm:$0xff]   ;;  %v2075_v38 = vld [vmem:[%s2794_s1 + $0x350] ss:$12 sps:$4 sm:$0xff]  }
  0x1e   :  { %1828 = vmatpush3.bf16.msra.mxu1 %v2004_v37  ;;  %v2039_v29 = vld [vmem:[%s2794_s1 + $0x214] ss:$12 sps:$4 sm:$0xff]   ;;  %v2070_v34 = vld [vmem:[%s2794_s1 + $0x338] ss:$12 sps:$4 sm:$0xff]  }
  0x1f   :  { %1052 = vmatpush1.bf16.msra.mxu0 %v1966_v27  ;;  %1829 = vmatprep.subr.bf16.mxu1 %v2006_v39  ;;  %v2061_v27 = vld [vmem:[%s2794_s1 + $0x3e0] ss:$12 sps:$4 sm:$0xff]   ;;  %v2049_v37 = vld [vmem:[%s2794_s1 + $0x244] ss:$12 sps:$4 sm:$0xff]   ;;  %v2076_v39 = vld [vmem:[%s2794_s1 + $0x428] ss:$12 sps:$4 sm:$0xff]  }
  0x20   :  { %1053 = vmatprep.subr.bf16.mxu0 %v1967_v28  ;;  %v2032_v28 = vld [vmem:[%s2794_s1 + $0x1f8] ss:$12 sps:$4 sm:$0xff]   ;;  %v2047_v40 = vld [vmem:[%s2794_s1 + $0x240] ss:$12 sps:$4 sm:$0xff]  }
  0x21   :  { %v2086_v49 = vld [vmem:[%s2794_s1 + $0x458] ss:$12 sps:$4 sm:$0xff]  }
  0x22   :  { %1830 = vmatpush3.bf16.msra.mxu1 %v2010_v43  ;;  %v27_v43 = vld [vmem:[%s2793_s0 + $0x28] sm:$0xff] }
  0x23   :  { %1054 = vmatpush1.bf16.msra.mxu0 %v1969_v31  ;;  %1831 = vmatprep.subr.bf16.mxu1 %v2011_v44  ;;  %v2066_v31 = vld [vmem:[%s2794_s1 + $0x3f8] ss:$12 sps:$4 sm:$0xff]   ;;  %v2081_v44 = vld [vmem:[%s2794_s1 + $0x440] ss:$12 sps:$4 sm:$0xff]  }
  0x24   :  { %1055 = vmatprep.subr.bf16.mxu0 %v1972_v32  ;;  %v2037_v32 = vld [vmem:[%s2794_s1 + $0x210] ss:$12 sps:$4 sm:$0xff]  }
  0x26   :  { %1832 = vmatpush3.bf16.msra.mxu1 %v2015_v47  ;;  %v2059_v47 = vld [vmem:[%s2794_s1 + $0x274] ss:$12 sps:$4 sm:$0xff]  }
  0x27   :  { %1056 = vmatpush1.bf16.msra.mxu0 %v1975_v35  ;;  %1839 = vmatprep.subr.bf16.mxu1 %v2016_v48  ;;  %v2071_v35 = vld [vmem:[%s2794_s1 + $0x410] ss:$12 sps:$4 sm:$0xff]   ;;  %v2085_v48 = vld [vmem:[%s2794_s1 + $0x380] ss:$12 sps:$4 sm:$0xff]  }
  0x28   :  { %1057 = vmatprep.subr.bf16.mxu0 %v1977_v36  ;;  %v2042_v36 = vld [vmem:[%s2794_s1 + $0x228] ss:$12 sps:$4 sm:$0xff]  }
  0x29   :  { %1234 = vmatmul.mubr.bf16.vlgmr.msra.gmra.mrb[4].mxu1 %v29_v53 }
  0x2a   :  { %1840 = vmatpush3.bf16.msra.mxu1 %v2020_v52  ;;  %1273 = vmatprep.mubr.bf16.mxu1 %v32_v12  ;;  %v2090_v52 = vld [vmem:[%s2794_s1 + $0x398] ss:$12 sps:$4 sm:$0xff]  }
  0x2b   :  { %1058 = vmatpush1.bf16.msra.mxu0 %v1980_v41  ;;  %1841 = vmatprep.subr.bf16.mxu1 %v2021_v54  ;;  %v2054_v41 = vld [vmem:[%s2794_s1 + $0x25c] ss:$12 sps:$4 sm:$0xff]  }
  0x2c   :  { %1059 = vmatprep.subr.bf16.mxu0 %v1982_v42  ;;  %v2080_v42 = vld [vmem:[%s2794_s1 + $0x368] ss:$12 sps:$4 sm:$0xff]  }
  0x2d   :  { %v2062_v54 = vld [vmem:[%s2794_s1 + $0x288] ss:$12 sps:$4 sm:$0xff]  }
  0x2e   :  { %1842 = vmatpush3.bf16.msra.mxu1 %v2025_v57  ;;  %v26_v57 = vld [vmem:[%s2793_s0 + $0x20] sm:$0xff] }
  0x2f   :  { %1060 = vmatpush1.bf16.msra.mxu0 %v1985_v45  ;;  %1843 = vmatprep.subr.bf16.mxu1 %v2026_v58  ;;  %v34_v45 = vpack.c.bf16 %v27_v43, %v27_v43  ;;  %v2067_v58 = vld [vmem:[%s2794_s1 + $0x2a0] ss:$12 sps:$4 sm:$0xff]  }
  0x30   :  { %1061 = vmatprep.subr.bf16.mxu0 %v1987_v46  ;;  %v2052_v46 = vld [vmem:[%s2794_s1 + $0x258] ss:$12 sps:$4 sm:$0xff]  }
  0x32   :  { %1844 = vmatpush3.bf16.msra.mxu1 %v2030_v61  ;;  %v2102_v61 = vld [vmem:[%s2794_s1 + $0x488] ss:$12 sps:$4 sm:$0xff]  }
  0x33   :  { %1062 = vmatpush1.bf16.msra.mxu0 %v1990_v50  ;;  %1845 = vmatprep.subr.bf16.mxu1 %v2031_v62  ;;  %v2057_v50 = vld [vmem:[%s2794_s1 + $0x270] ss:$12 sps:$4 sm:$0xff]   ;;  %v2195_v62 = vmov 0.0  }
  0x34   :  { %1063 = vmatprep.subr.bf16.mxu0 %v1992_v51  ;;  %v2064_v51 = vld [vmem:[%s2794_s1 + $0x28c] ss:$12 sps:$4 sm:$0xff]  }
  0x36   :  { %1846 = vmatpush3.bf16.msra.mxu1 %v2035_v1  ;;  %v2077_v1 = vld [vmem:[%s2794_s1 + $0x2d0] ss:$12 sps:$4 sm:$0xff]  }
  0x37   :  { %1064 = vmatpush1.bf16.msra.mxu0 %v1995_v55  ;;  %1847 = vmatprep.subr.bf16.mxu1 %v2036_v2  ;;  %v2069_v55 = vld [vmem:[%s2794_s1 + $0x2a4] ss:$12 sps:$4 sm:$0xff]   ;;  %v2084_v2 = vld [vmem:[%s2794_s1 + $0x2ec] ss:$12 sps:$4 sm:$0xff]  }
  0x38   :  { %1065 = vmatprep.subr.bf16.mxu0 %v1997_v56  ;;  %v2095_v56 = vld [vmem:[%s2794_s1 + $0x3b0] ss:$12 sps:$4 sm:$0xff]  }
  0x3a   :  { %1848 = vmatpush3.bf16.msra.mxu1 %v2040_v5  ;;  %v2087_v5 = vld [vmem:[%s2794_s1 + $0x300] ss:$12 sps:$4 sm:$0xff]  }
  0x3b   :  { %1066 = vmatpush1.bf16.msra.mxu0 %v2000_v59  ;;  %1849 = vmatprep.subr.bf16.mxu1 %v2041_v6  ;;  %v2580_v59 = vpack.c.bf16 %v26_v57, %v26_v57  ;;  %v2094_v6 = vld [vmem:[%s2794_s1 + $0x31c] ss:$12 sps:$4 sm:$0xff]  }
  0x3c   :  { %1067 = vmatprep.subr.bf16.mxu0 %v2002_v60  ;;  %v2074_v60 = vld [vmem:[%s2794_s1 + $0x2bc] ss:$12 sps:$4 sm:$0xff]  }
  0x3e   :  { %1850 = vmatpush3.bf16.msra.mxu1 %v2045_v9 }
  0x3f   :  { %1068 = vmatpush1.bf16.msra.mxu0 %v2005_v63  ;;  %1851 = vmatprep.subr.bf16.mxu1 %v2046_v10  ;;  %v2072_v63 = vld [vmem:[%s2794_s1 + $0x2b8] ss:$12 sps:$4 sm:$0xff]  }
  0x40   :  { %1078 = vmatprep.subr.bf16.mxu0 %v2009_v0  ;;  %v2079_v0 = vld [vmem:[%s2794_s1 + $0x2d4] ss:$12 sps:$4 sm:$0xff]  }
  0x42   :  { %1070 = vmatmul.mubr.bf16.vlgmr.msra.gmra.mrb[0].mxu0 %v29_v53  ;;  %1852 = vmatpush3.bf16.msra.mxu1 %v2050_v15  ;;  %v2091_v53 = vld [vmem:[%s2794_s1 + $0x470] ss:$12 sps:$4 sm:$0xff]  }
  0x43   :  { %1079 = vmatpush1.bf16.msra.mxu0 %v2007_v3  ;;  %1110 = vmatprep.mubr.bf16.mxu0 %v32_v12  ;;  %v2082_v3 = vld [vmem:[%s2794_s1 + $0x2e8] ss:$12 sps:$4 sm:$0xff]  }
  0x44   :  { %1080 = vmatprep.subr.bf16.mxu0 %v2014_v4  ;;  %1853 = vmatprep.subr.bf16.mxu1 %v2051_v18  ;;  %v2089_v4 = vld [vmem:[%s2794_s1 + $0x304] ss:$12 sps:$4 sm:$0xff]  }
  0x46   :  { %1854 = vmatpush3.bf16.msra.mxu1 %v2055_v20 }
  0x47   :  { %1081 = vmatpush1.bf16.msra.mxu0 %v2012_v7  ;;  %1861 = vmatprep.subr.bf16.mxu1 %v2056_v22 }
  0x48   :  { %1082 = vmatprep.subr.bf16.mxu0 %v2019_v8 }
  0x49   :  { %1274 = vmatmul.mubr.bf16.vlgmr.msra.gmra.mrb[8].mxu1 %v2481_v25 }
  0x4a   :  { %1862 = vmatpush3.bf16.msra.mxu1 %v2060_v26  ;;  %1313 = vmatprep.mubr.bf16.mxu1 %v34_v45 }
  0x4b   :  { %1083 = vmatpush1.bf16.msra.mxu0 %v2017_v13  ;;  %1863 = vmatprep.subr.bf16.mxu1 %v2061_v27 }
  0x4c   :  { %1084 = vmatprep.subr.bf16.mxu0 %v2024_v14 }
  0x4e   :  { %1864 = vmatpush3.bf16.msra.mxu1 %v2065_v30 }
  0x4f   :  { %1085 = vmatpush1.bf16.msra.mxu0 %v2022_v17  ;;  %1865 = vmatprep.subr.bf16.mxu1 %v2066_v31 }
  0x50   :  { %1086 = vmatprep.subr.bf16.mxu0 %v2029_v19 }
  0x52   :  { %1866 = vmatpush3.bf16.msra.mxu1 %v2070_v34 }
  0x53   :  { %1087 = vmatpush1.bf16.msra.mxu0 %v2027_v23  ;;  %1867 = vmatprep.subr.bf16.mxu1 %v2071_v35 }
  0x54   :  { %1088 = vmatprep.subr.bf16.mxu0 %v2034_v24 }
  0x56   :  { %1868 = vmatpush3.bf16.msra.mxu1 %v2075_v38 }
  0x57   :  { %1089 = vmatpush1.bf16.msra.mxu0 %v2032_v28  ;;  %1869 = vmatprep.subr.bf16.mxu1 %v2076_v39 }
  0x58   :  { %1090 = vmatprep.subr.bf16.mxu0 %v2039_v29 }
  0x5a   :  { %1870 = vmatpush3.bf16.msra.mxu1 %v2080_v42 }
  0x5b   :  { %1091 = vmatpush1.bf16.msra.mxu0 %v2037_v32  ;;  %1871 = vmatprep.subr.bf16.mxu1 %v2081_v44 }
  0x5c   :  { %1092 = vmatprep.subr.bf16.mxu0 %v2044_v33 }
  0x5e   :  { %1872 = vmatpush3.bf16.msra.mxu1 %v2085_v48 }
  0x5f   :  { %1093 = vmatpush1.bf16.msra.mxu0 %v2042_v36  ;;  %1873 = vmatprep.subr.bf16.mxu1 %v2086_v49 }
  0x60   :  { %1094 = vmatprep.subr.bf16.mxu0 %v2049_v37 }
  0x62   :  { %1874 = vmatpush3.bf16.msra.mxu1 %v2090_v52 }
  0x63   :  { %1095 = vmatpush1.bf16.msra.mxu0 %v2047_v40  ;;  %1875 = vmatprep.subr.bf16.mxu1 %v2091_v53 }
  0x64   :  { %1096 = vmatprep.subr.bf16.mxu0 %v2054_v41 }
  0x66   :  { %1876 = vmatpush3.bf16.msra.mxu1 %v2095_v56 }
  0x67   :  { %1097 = vmatpush1.bf16.msra.mxu0 %v2052_v46  ;;  %1911 = vmatprep.subr.bf16.mxu1 %v2195_v62 }
  0x68   :  { %1098 = vmatprep.subr.bf16.mxu0 %v2059_v47 }
  0x69   :  { %1314 = vmatmul.mubr.bf16.vlgmr.msra.gmra.mrb[12].mxu1 %v2580_v59 }
  0x6a   :  { %1912 = vmatpush3.bf16.msra.mxu1 %v2102_v61  ;;  %1913 = vmatprep.mubr.msk.bf16.mxu1 %vm2196_vm1, %v2195_v62 }
  0x6b   :  { %1099 = vmatpush1.bf16.msra.mxu0 %v2057_v50 }
  0x6c   :  { %1100 = vmatprep.subr.bf16.mxu0 %v2064_v51 }
  0x6f   :  { %1101 = vmatpush1.bf16.msra.mxu0 %v2062_v54 }
  0x70   :  { %1102 = vmatprep.subr.bf16.mxu0 %v2069_v55 }
  0x71   :  { %1914 = vmatmul.mubr.msk.bf16.vlgmr.msra.gmra.mrb[16].mxu1 %vm1033_vm0, %v2273_v16 }
  0x73   :  { %1103 = vmatpush1.bf16.msra.mxu0 %v2067_v58 }
  0x74   :  { %1104 = vmatprep.subr.bf16.mxu0 %v2074_v60 }
  0x77   :  { %1105 = vmatpush1.bf16.msra.mxu0 %v2072_v63 }
  0x78   :  { %1106 = vmatprep.subr.bf16.mxu0 %v2079_v0 }
  0x7b   :  { %1107 = vmatpush1.bf16.msra.mxu0 %v2077_v1 }
  0x7c   :  { %1108 = vmatprep.subr.bf16.mxu0 %v2084_v2 }
  0x7f   :  { %1109 = vmatpush1.bf16.msra.mxu0 %v2082_v3 }
  0x80   :  { %1119 = vmatprep.subr.bf16.mxu0 %v2089_v4 }
  0x81   :  { %10 = vsyncpa [#allocation3], 0  ;;  %v2092_v7 = vld [vmem:[%s2794_s1 + $0x318] ss:$12 sps:$4 sm:$0xff]   ;;  %v2098_v16 = vld [vmem:[%s2794_s1 + $0x334] ss:$12 sps:$4 sm:$0xff]   ;;  %v234_v46 = vlaneseq }
  0x82   :  { %1111 = vmatmul.mubr.bf16.vlgmr.msra.gmra.mrb[0].mxu0 %v2481_v25  ;;  %v2096_v8 = vld [vmem:[%s2794_s1 + $0x330] ss:$12 sps:$4 sm:$0xff]   ;;  %v2101_v9 = vld [vmem:[%s2794_s1 + $0x34c] ss:$12 sps:$4 sm:$0xff]   ;;  %v2099_v10 = vld [vmem:[%s2794_s1 + $0x348] ss:$12 sps:$4 sm:$0xff]  }
  0x83   :  { %1120 = vmatpush1.bf16.msra.mxu0 %v2087_v5  ;;  %1151 = vmatprep.mubr.bf16.mxu0 %v34_v45  ;;  %v2105_v11 = vld [vmem:[%s2794_s1 + $0x364] ss:$12 sps:$4 sm:$0xff]   ;;  %v2103_v12 = vld [vmem:[%s2794_s1 + $0x360] ss:$12 sps:$4 sm:$0xff]   ;;  %v2108_v13 = vld [vmem:[%s2794_s1 + $0x37c] ss:$12 sps:$4 sm:$0xff]  }
  0x84   :  { %1121 = vmatprep.subr.bf16.mxu0 %v2094_v6  ;;  %v2106_v14 = vld [vmem:[%s2794_s1 + $0x378] ss:$12 sps:$4 sm:$0xff]   ;;  %v2111_v15 = vld [vmem:[%s2794_s1 + $0x394] ss:$12 sps:$4 sm:$0xff]   ;;  %v2109_v17 = vld [vmem:[%s2794_s1 + $0x390] ss:$12 sps:$4 sm:$0xff]  }
  0x85   :  { %v2114_v18 = vld [vmem:[%s2794_s1 + $0x3ac] ss:$12 sps:$4 sm:$0xff]   ;;  %v2112_v19 = vld [vmem:[%s2794_s1 + $0x3a8] ss:$12 sps:$4 sm:$0xff]   ;;  %v2117_v20 = vld [vmem:[%s2794_s1 + $0x3c4] ss:$12 sps:$4 sm:$0xff]  }
  0x86   :  { %v2115_v21 = vld [vmem:[%s2794_s1 + $0x3c0] ss:$12 sps:$4 sm:$0xff]   ;;  %v2120_v22 = vld [vmem:[%s2794_s1 + $0x3dc] ss:$12 sps:$4 sm:$0xff]   ;;  %v2118_v23 = vld [vmem:[%s2794_s1 + $0x3d8] ss:$12 sps:$4 sm:$0xff]  }
  0x87   :  { %1122 = vmatpush1.bf16.msra.mxu0 %v2092_v7  ;;  %v2123_v24 = vld [vmem:[%s2794_s1 + $0x3f4] ss:$12 sps:$4 sm:$0xff]   ;;  %v2121_v25 = vld [vmem:[%s2794_s1 + $0x3f0] ss:$12 sps:$4 sm:$0xff]   ;;  %v2126_v26 = vld [vmem:[%s2794_s1 + $0x40c] ss:$12 sps:$4 sm:$0xff]  }
  0x88   :  { %1123 = vmatprep.subr.bf16.mxu0 %v2098_v16  ;;  %v2124_v27 = vld [vmem:[%s2794_s1 + $0x408] ss:$12 sps:$4 sm:$0xff]   ;;  %v2129_v28 = vld [vmem:[%s2794_s1 + $0x424] ss:$12 sps:$4 sm:$0xff]   ;;  %v2127_v29 = vld [vmem:[%s2794_s1 + $0x420] ss:$12 sps:$4 sm:$0xff]  }
  0x89   :  { %v2132_v30 = vld [vmem:[%s2794_s1 + $0x43c] ss:$12 sps:$4 sm:$0xff]   ;;  %v2130_v31 = vld [vmem:[%s2794_s1 + $0x438] ss:$12 sps:$4 sm:$0xff]   ;;  %v2135_v32 = vld [vmem:[%s2794_s1 + $0x454] ss:$12 sps:$4 sm:$0xff]  }
  0x8a   :  { %v2133_v33 = vld [vmem:[%s2794_s1 + $0x450] ss:$12 sps:$4 sm:$0xff]   ;;  %v2138_v34 = vld [vmem:[%s2794_s1 + $0x46c] ss:$12 sps:$4 sm:$0xff]   ;;  %v2136_v35 = vld [vmem:[%s2794_s1 + $0x468] ss:$12 sps:$4 sm:$0xff]  }
  0x8b   :  { %1124 = vmatpush1.bf16.msra.mxu0 %v2096_v8  ;;  %v2139_v45 = vld [vmem:[%s2796_s3 + $0x40] sm:$0xff]   ;;  %v2141_v48 = vld [vmem:[%s2796_s3 + $0x48] sm:$0xff]   ;;  %v235_v49 = vshrl.u32 %v234_v46, 7  ;;  %v2143_v51 = vld [vmem:[%s2796_s3 + $0x50] sm:$0xff]   ;;  %vm1544_vm2 = vcmask 1045504   ;;  %vm1540_vm3 = vcmask 359424  }
  0x8c   :  { %1125 = vmatprep.subr.bf16.mxu0 %v2101_v9  ;;  %v2140_v47 = vld [vmem:[%s2796_s3] sm:$0xff]   ;;  %1885 = vmatprep.subr.bf16.mxu1 %v2139_v45  ;;  %v2142_v50 = vld [vmem:[%s2796_s3 + $0x8] sm:$0xff]   ;;  %v2144_v53 = vld [vmem:[%s2796_s3 + $0x10] sm:$0xff]   ;;  %vm1628_vm4 = vcmask 80896  }
  0x8d   :  { %1886 = vmatpush3.bf16.msra.mxu1 %v2140_v47  ;;  %v244_v52 = vsub.s32 2, %v235_v49  ;;  %v232_v54 = vld [vmem:[%s2795_s2] sm:$0x7]  ;;  %v2145_v55 = vld [vmem:[%s2796_s3 + $0x58] sm:$0xff]   ;;  %v2149_v3 = vld [vmem:[%s2796_s3 + $0x68] sm:$0xff]  }
  0x8e   :  { %1887 = vmatprep.subr.bf16.mxu1 %v2141_v48  ;;  %v2146_v57 = vld [vmem:[%s2796_s3 + $0x18] sm:$0xff]   ;;  %v2147_v58 = vld [vmem:[%s2796_s3 + $0x60] sm:$0xff]   ;;  %v2150_v4 = vld [vmem:[%s2796_s3 + $0x28] sm:$0xff]  }
  0x8f   :  { %1126 = vmatpush1.bf16.msra.mxu0 %v2099_v10  ;;  %v245_v56 = vrot.slane %v232_v54, %v244_v52  ;;  %v2148_v61 = vld [vmem:[%s2796_s3 + $0x20] sm:$0xff]   ;;  %v2151_v5 = vld [vmem:[%s2796_s3 + $0x70] sm:$0xff]   ;;  %v2153_v16 = vld [vmem:[%s2796_s3 + $0x78] sm:$0xff]  }
  0x90   :  { %1127 = vmatprep.subr.bf16.mxu0 %v2105_v11  ;;  %v2152_v7 = vld [vmem:[%s2796_s3 + $0x30] sm:$0xff]   ;;  %v2154_v8 = vld [vmem:[%s2796_s3 + $0x38] sm:$0xff]   ;;  %v2156_v47 = vld [vmem:[%s2796_s3 + $0x88] sm:$0xff]  }
  0x91   :  { %1888 = vmatpush3.bf16.msra.mxu1 %v2142_v50  ;;  %v2157_v48 = vld [vmem:[%s2796_s3 + $0x90] sm:$0x3f]  }
  0x92   :  { %1889 = vmatprep.subr.bf16.mxu1 %v2143_v51 }
  0x93   :  { %1128 = vmatpush1.bf16.msra.mxu0 %v2103_v12 }
  0x94   :  { %1129 = vmatprep.subr.bf16.mxu0 %v2108_v13 }
  0x95   :  { %1890 = vmatpush3.bf16.msra.mxu1 %v2144_v53 }
  0x96   :  { %1891 = vmatprep.subr.bf16.mxu1 %v2145_v55 }
  0x97   :  { %1130 = vmatpush1.bf16.msra.mxu0 %v2106_v14 }
  0x98   :  { %1131 = vmatprep.subr.bf16.mxu0 %v2111_v15 }
  0x99   :  { %1892 = vmatpush3.bf16.msra.mxu1 %v2146_v57  ;;  %v1796_v57 = vld [vmem:[%s2797_s4] ss:$0 sm:$0xff] }
  0x9a   :  { %1893 = vmatprep.subr.bf16.mxu1 %v2147_v58 }
  0x9b   :  { %1132 = vmatpush1.bf16.msra.mxu0 %v2109_v17 }
  0x9c   :  { %1133 = vmatprep.subr.bf16.mxu0 %v2114_v18 }
  0x9d   :  { %1894 = vmatpush3.bf16.msra.mxu1 %v2148_v61 }
  0x9e   :  { %1895 = vmatprep.subr.bf16.mxu1 %v2149_v3 }
  0x9f   :  { %1134 = vmatpush1.bf16.msra.mxu0 %v2112_v19 }
  0xa0   :  { %1135 = vmatprep.subr.bf16.mxu0 %v2117_v20 }
  0xa1   :  { %1896 = vmatpush3.bf16.msra.mxu1 %v2150_v4 }
  0xa2   :  { %1897 = vmatprep.subr.bf16.mxu1 %v2151_v5 }
  0xa3   :  { %1136 = vmatpush1.bf16.msra.mxu0 %v2115_v21  ;;  %v236_v21 = vsub.s32 0, %v235_v49 }
  0xa4   :  { %1137 = vmatprep.subr.bf16.mxu0 %v2120_v22  ;;  %v240_v22 = vsub.s32 1, %v235_v49  ;;  %v1546_v49 = vsel %vm1544_vm2, %v2157_v48, 0 }
  0xa5   :  { %1898 = vmatpush3.bf16.msra.mxu1 %v2152_v7 }
  0xa6   :  { %1899 = vmatprep.subr.bf16.mxu1 %v2153_v16 }
  0xa7   :  { %1138 = vmatpush1.bf16.msra.mxu0 %v2118_v23  ;;  %v237_v23 = vrot.slane %v232_v54, %v236_v21 }
  0xa8   :  { %1139 = vmatprep.subr.bf16.mxu0 %v2123_v24  ;;  %v241_v24 = vrot.slane %v232_v54, %v240_v22 }
  0xa9   :  { %1900 = vmatpush3.bf16.msra.mxu1 %v2154_v8 }
  0xaa   :  { %1917 = vmatprep.subr.bf16.mxu1 %v2195_v62 }
  0xab   :  { %1140 = vmatpush1.bf16.msra.mxu0 %v2121_v25 }
  0xac   :  { %1141 = vmatprep.subr.bf16.mxu0 %v2126_v26 }
  0xaf   :  { %1142 = vmatpush1.bf16.msra.mxu0 %v2124_v27 }
  0xb0   :  { %1143 = vmatprep.subr.bf16.mxu0 %v2129_v28 }
  0xb3   :  { %1144 = vmatpush1.bf16.msra.mxu0 %v2127_v29 }
  0xb4   :  { %1145 = vmatprep.subr.bf16.mxu0 %v2132_v30 }
  0xb7   :  { %1146 = vmatpush1.bf16.msra.mxu0 %v2130_v31 }
  0xb8   :  { %1147 = vmatprep.subr.bf16.mxu0 %v2135_v32 }
  0xbb   :  { %1148 = vmatpush1.bf16.msra.mxu0 %v2133_v33 }
  0xbc   :  { %1149 = vmatprep.subr.bf16.mxu0 %v2138_v34 }
  0xbf   :  { %1150 = vmatpush1.bf16.msra.mxu0 %v2136_v35 }
  0xc2   :  { %1152 = vmatmul.mubr.bf16.vlgmr.msra.gmra.mrb[0].mxu0 %v2580_v59 }
  0xdc   :  { %v2707_v36 = vpop.f32.mrb[0].mxu1 }
  0xdd   :  { %v2709_v37 = vpop.f32.mrb[1].mxu1 }
  0xde   :  { %v1198_v38 = vpop.f32.mrb[2].mxu1 }
  0xdf   :  { %v1199_v39 = vpop.f32.mrb[3].mxu1 }
  0xfc   :  { %v1833_v40 = vpop.f32.mrb[4].mxu1 }
  0xfd   :  { %v1834_v41 = vpop.f32.mrb[5].mxu1 }
  0xfe   :  { %v1835_v42 = vadd.f32 %v1834_v41, %v1833_v40  ;;  %v1836_v43 = vpop.f32.mrb[6].mxu1 }
  0xff   :  { %v1837_v44 = vpop.f32.mrb[7].mxu1 }
 0x100   :  { %v1236_v59 = vadd.f32 %v1835_v42, %v245_v56 }
 0x11c   :  { %v1855_v60 = vpop.f32.mrb[8].mxu1 }
 0x11d   :  { %v1856_v63 = vpop.f32.mrb[9].mxu1 }
 0x11e   :  { %v1857_v0 = vadd.f32 %v1856_v63, %v1855_v60  ;;  %v1858_v1 = vpop.f32.mrb[10].mxu1 }
 0x11f   :  { %v1859_v2 = vpop.f32.mrb[11].mxu1 }
 0x120   :  { %v1276_v6 = vadd.f32 %v1857_v0, %v1236_v59 }
 0x13c   :  { %v1877_v9 = vpop.f32.mrb[12].mxu1 }
 0x13d   :  { %v1878_v10 = vpop.f32.mrb[13].mxu1 }
 0x13e   :  { %v1879_v11 = vadd.f32 %v1878_v10, %v1877_v9  ;;  %v1880_v12 = vpop.f32.mrb[14].mxu1 }
 0x13f   :  { %v1881_v13 = vpop.f32.mrb[15].mxu1 }
 0x140   :  { %v1316_v14 = vadd.f32 %v1879_v11, %v1276_v6 }
 0x144   :  { %v1355_v15 = vpop.f32.mrb[16].mxu1 }
 0x145   :  { %v1356_v17 = vadd.f32 %v1355_v15, %v1316_v14  ;;  %v1915_v18 = vpop.f32.mrb[17].mxu1 }
 0x146   :  { %v1358_v19 = vpop.f32.mrb[18].mxu1 }
 0x147   :  { %v1916_v20 = vpop.f32.mrb[19].mxu1  ;;  %v1795_v35 = vmul.f32 -1.442695, %v1356_v17 }
 0x195   :  { %v1153_v25 = vpop.f32.mrb[0].mxu0 }
 0x196   :  { %v1927_v26 = vadd.f32 %v1153_v25, %v237_v23  ;;  %v1155_v27 = vpop.f32.mrb[1].mxu0 }
 0x197   :  { %v1929_v28 = vadd.f32 %v1155_v27, %v241_v24  ;;  %v1157_v29 = vpop.f32.mrb[2].mxu0 }
 0x198   :  { %v1928_v30 = vadd.f32 %v1927_v26, %v2707_v36  ;;  %v1158_v31 = vpop.f32.mrb[3].mxu0 }
 0x199   :  { %v1930_v32 = vadd.f32 %v1929_v28, %v2709_v37  ;;  %v2155_v37 = vld [vmem:[%s2796_s3 + $0x80] sm:$0xff]   ;;  %s2197_s3 = smov [#allocation2]  }
 0x19a   :  { %v1793_v33 = vmul.f32 -1.442695, %v1928_v30  ;;  %s1636_s10 = sshll.u32 %s2197_s3, 4  ;;  %s1637_s10 = int_to_ptr.vmem [resolvable:$true] %s1636_s10 }
 0x19b   :  { %v1794_v34 = vmul.f32 -1.442695, %v1930_v32  ;;  %s2170_s11 = scalar_lea.vmem %s1637_s10, 128  ;;  %p2175_p1 = scmp.lt.s32.totalorder %s1637_s10, %s1637_s10 }
 0x19c   :  { %2158 = vpow2.f32 %v1793_v33  ;;  %p2171_p0 = scmp.ne.s32.totalorder %s1637_s10, %s2170_s11  ;;  %p2176_p2 = scmp.lt.s32.totalorder %s2170_s11, %s2170_s11 }
 0x19d   :  { %2160 = vpow2.f32 %v1794_v34 }
 0x19e   :  { %2162 = vpow2.f32 %v1795_v35  ;;  %p2177_p3 = por %p2176_p2, %p2175_p1 }
 0x1a0   :  { %p2178_p4 = pnand %p2177_p3, %p2171_p0 }
 0x1a6   :  { %v2159_v38 = vpop.eup %2158 }
 0x1a7   :  { %v2161_v39 = vpop.eup %2160  ;;  %v1370_v40 = vadd.f32 1.0, %v2159_v38 }
 0x1a8   :  { %v1371_v41 = vadd.f32 1.0, %v2161_v39  ;;  %v2163_v42 = vpop.eup %2162 }
 0x1a9   :  { %2164 = vrcp.f32 %v1370_v40  ;;  %v1372_v43 = vadd.f32 1.0, %v2163_v42 }
 0x1aa   :  { %2166 = vrcp.f32 %v1371_v41 }
 0x1ab   :  { %2168 = vrcp.f32 %v1372_v43 }
 0x1b3   :  { %v2165_v44 = vpop.eup %2164 }
 0x1b4   :  { %v2167_v45 = vpop.eup %2166  ;;  %v1379_v46 = vpack.c.bf16 %v2165_v44, %v2165_v44 }
 0x1b5   :  { %v1380_v36 = vpack.c.bf16 %v2167_v45, %v2167_v45  ;;  %v2169_v50 = vpop.eup %2168 }
 0x1b6   :  { %v1381_v51 = vpack.c.bf16 %v2169_v50, %v2169_v50 }
 0x1b7   :  { %1580 = vmatprep.mubr.bf16.mxu1 %v1380_v36 }
 0x1b8   :  { %1581 = vmatmul.mubr.bf16.vlgmr.msra.gmra.mrb[20].mxu1 %v1379_v46 }
 0x1b9   :  { %1918 = vmatpush3.bf16.msra.mxu1 %v2155_v37  ;;  %1923 = vmatprep.mubr.msk.bf16.mxu1 %vm2196_vm1, %v2195_v62 }
 0x1ba   :  { %1919 = vmatprep.subr.bf16.mxu1 %v2195_v62 }
 0x1bd   :  { %1920 = vmatpush3.bf16.msra.mxu1 %v2156_v47 }
 0x1be   :  { %1921 = vmatprep.subr.bf16.mxu1 %v2195_v62 }
 0x1c1   :  { %1922 = vmatpush3.bf16.msra.mxu1 %v1546_v49 }
 0x1c4   :  { %1924 = vmatmul.mubr.msk.bf16.vlgmr.msra.gmra.mrb[24].mxu1 %vm1540_vm3, %v1381_v51 }
 0x28b   :  { %v1901_v52 = vpop.f32.mrb[20].mxu1 }
 0x28c   :  { %v1902_v53 = vpop.f32.mrb[21].mxu1 }
 0x28d   :  { %v1903_v54 = vadd.f32 %v1902_v53, %v1901_v52  ;;  %v1904_v55 = vpop.f32.mrb[22].mxu1 }
 0x28e   :  { %v1905_v56 = vpop.f32.mrb[23].mxu1 }
 0x28f   :  { %v1583_v58 = vadd.f32 %v1903_v54, %v1796_v57 }
 0x297   :  { %v1622_v59 = vpop.f32.mrb[24].mxu1 }
 0x298   :  { %v1623_v62 = vadd.f32 %v1622_v59, %v1583_v58  ;;  %v1925_v60 = vpop.f32.mrb[25].mxu1 }
 0x299   :  { %v1625_v61 = vpop.f32.mrb[26].mxu1 }
 0x29a   :  { %v1926_v63 = vpop.f32.mrb[27].mxu1  ;;  %1629 = vst.msk [vmem:[#allocation2] sm:$0xff] %vm1628_vm4, %v1623_v62 }
 0x29b   :  { %2181 = shalt.err (!%p2178_p4)
}
 0x29c   :  { %s2182_s13 = scalar_lea.hbm %s2798_s5, 128 }
 0x29d   :  { %p2183_p5 = scmp.ne.s32.totalorder %s2798_s5, %s2182_s13  ;;  %p2186_p6 = scmp.lt.u32.totalorder %s2182_s13, %s2798_s5 }
 0x29f   :  { %p2188_p7 = pnand %p2186_p6, %p2183_p5 }
 0x2a1   :  { %2191 = shalt.err (!%p2188_p7)
}
 0x2a2   :  { %1639 = dma.vmem_to_hbm [thread:$0]  %s1637_s10, 128, %s2798_s5, [#allocation3]  }
 0x2a3   :  { %2192 = dma.done.wait [#allocation3], 128  }
 0x2a4   :  { %2193 = vsyncadd [#allocation3], 4294967168 }
 0x2a5   :  { %1643 = vsyncpa [#allocation3], 1 }

</bundles_post_ra>
